<compile_context>
chip_gen: v6e
topology: v6e:2x2x1
jax: 0.10.0
libtpu: 0.0.40
codegen_flags: <defaults>
</compile_context>

<pallas_src>
import functools

import jax
import jax.numpy as jnp
from jax.experimental import pallas as pl
from jax.experimental.pallas import tpu as pltpu


def _round_up(x: int, m: int) -> int:
    return ((x + m - 1) // m) * m


def _tpu_kind() -> str:
    try:
        return jax.devices()[0].device_kind.lower()
    except Exception:
        return ""


def choose_tiles(M: int, K: int, N: int, *, tpu_kind=None):
    """Pick MXU-friendly tile sizes, per TPU generation, clamped for small problems."""
    kind = (tpu_kind if tpu_kind is not None else _tpu_kind())
    kind = kind.lower()
    if "v6" in kind or "6e" in kind:
        # v6e: highest flops/HBM ratio -> biggest tiles so each grid step carries
        # >= ~1 us of MXU work (amortizes ~0.35 us/step overhead).
        tm_max, tn_max, tk_max = 512, 1024, 1024
    elif "v7" in kind or "7x" in kind:
        # v7x: only 64 MiB VMEM but 3.2 TB/s HBM -> compute-bound at smaller tiles.
        tm_max, tn_max, tk_max = 512, 512, 1024
    else:
        # v5e / v4 / unknown: 128^2-class MXU, weakest HBM; modest tiles suffice.
        tm_max, tn_max, tk_max = 256, 256, 512

    tm = min(tm_max, _round_up(M, 16))    # multiple of 16 (bf16 sublane pack, and of 8)
    tn = min(tn_max, _round_up(N, 128))   # lane-dense output tile (unmasked vst)
    tk = min(tk_max, _round_up(K, 128))   # lane-dense reduction tile

    # Prefer a tm that divides M, so the per-forward activation pad is a no-op.
    if M > tm and M % tm != 0:
        for cand in (tm // 2, tm // 4):
            if cand >= 128 and M % cand == 0:
                tm = cand
                break

    # Megacore: if the i (M) axis has a single tile (decode-sized M), make sure the
    # j (N) axis has extent >= 2 so the second TensorCore gets work.
    if M <= tm and N > 128:
        tn = min(tn, max(128, _round_up((N + 1) // 2, 128)))

    return tm, tn, tk


def prepare_lora_weights(base_weight, lora_a, lora_b, scaling, *, tn, tk,
                         compute_dtype=None):
    """One-time weight prep (do NOT run per forward call).

    base_weight: (out_features, in_features)  -- torch nn.Linear.weight layout
    lora_a:      (r, in_features)
    lora_b:      (out_features, r)
    Returns lane-dense, zero-padded (K_pad, N_pad), (K_pad, r_pad), (r_pad, N_pad)
    operands, with `scaling` folded into B^T and A^T/B^T pre-cast to compute_dtype.
    """
    N, K = base_weight.shape
    r = lora_a.shape[0]
    if compute_dtype is None:
        compute_dtype = base_weight.dtype
    K_pad = _round_up(K, tk)
    N_pad = _round_up(N, tn)
    r_pad = _round_up(r, 128)

    w_t = jnp.pad(base_weight.T, ((0, K_pad - K), (0, N_pad - N)))            # (K_pad, N_pad)
    a_t = jnp.pad(lora_a.T.astype(jnp.float32),
                  ((0, K_pad - K), (0, r_pad - r))).astype(compute_dtype)     # (K_pad, r_pad)
    b_t = jnp.pad(lora_b.T.astype(jnp.float32) * jnp.float32(scaling),
                  ((0, r_pad - r), (0, N_pad - N))).astype(compute_dtype)     # (r_pad, N_pad)
    return w_t, a_t, b_t


def _lora_linear_kernel(x_ref, w_ref, t_ref, b_ref, o_ref, acc_ref):
    # grid = (M_pad//tm, N_pad//tn, K_pad//tk); K is the reduction axis (last).
    # x_ref: (tm, tk)   w_ref: (tk, tn)   t_ref: (tm, r_pad)   b_ref: (r_pad, tn)
    # o_ref: (tm, tn)   acc_ref: (tm, tn) f32 scratch
    k = pl.program_id(2)

    @pl.when(k == 0)
    def _init():
        acc_ref[...] = jnp.zeros_like(acc_ref)

    # Base linear: native-dtype operands, fp32 accumulation on the MXU.
    acc_ref[...] += jnp.dot(x_ref[...], w_ref[...], preferred_element_type=jnp.float32)

    @pl.when(k == pl.num_programs(2) - 1)
    def _finalize():
        # LoRA up-projection: pre-computed t = x @ A^T (done once, host-side GEMM),
        # native-dtype operands, scaling already folded into B^T.
        lora = jnp.dot(t_ref[...], b_ref[...], preferred_element_type=jnp.float32)
        o_ref[...] = (acc_ref[...] + lora).astype(o_ref.dtype)


@functools.partial(jax.jit, static_argnames=("out_features", "tm", "tn", "tk"))
def lora_linear_forward(hidden_states, w_t, a_t, b_t, *, out_features, tm, tn, tk):
    """Forward of `Linear` (base linear + single LoRA adapter).

    hidden_states: (B, S, in_features)
    w_t / a_t / b_t: outputs of prepare_lora_weights (pre-transposed, padded, scaled, cast)
    returns: (B, S, out_features) in hidden_states.dtype
    """
    B, S, K = hidden_states.shape
    K_pad, N_pad = w_t.shape
    r_pad = a_t.shape[1]
    M = B * S
    M_pad = _round_up(M, tm)

    xm = hidden_states.reshape(M, K)
    if M_pad != M or K_pad != K:
        # Only materialized when the shape is actually ragged w.r.t. the tiles.
        xm = jnp.pad(xm, ((0, M_pad - M), (0, K_pad - K)))

    # LoRA down-projection as one tiny separate GEMM (M x K x r_pad), fp32 accum,
    # result cast to the activation dtype so the in-kernel up-projection uses
    # native-dtype MXU operands.  This avoids recomputing x @ A^T for every N tile
    # and re-streaming the A slab from HBM on every grid step.
    t = jnp.dot(xm, a_t, preferred_element_type=jnp.float32).astype(hidden_states.dtype)

    grid = (M_pad // tm, N_pad // tn, K_pad // tk)
    gi, gj, gk = grid

    x_isz = jnp.dtype(hidden_states.dtype).itemsize
    w_isz = jnp.dtype(w_t.dtype).itemsize
    b_isz = jnp.dtype(b_t.dtype).itemsize

    # Streamed-traffic-aware cost estimate (W once per i tile, x once per j tile,
    # t once per i tile, B once per (i, j), output written once).
    cost = pl.CostEstimate(
        flops=2 * M_pad * N_pad * K_pad + 2 * M_pad * r_pad * N_pad,
        transcendentals=0,
        bytes_accessed=int(
            M_pad * K_pad * x_isz * gj
            + K_pad * N_pad * w_isz * gi
            + M_pad * r_pad * x_isz
            + N_pad * r_pad * b_isz * gi
            + M_pad * N_pad * x_isz
        ),
    )

    # Explicit scoped-VMEM budget: rough double-buffered estimate x2 margin,
    # never below the 32 MiB default and never above 48 MiB (safe on v7x's 64 MiB).
    vmem_est = (2 * tm * tk * x_isz + 2 * tk * tn * w_isz
                + 2 * tm * r_pad * x_isz + 2 * r_pad * tn * b_isz
                + 2 * tm * tn * x_isz + tm * tn * 4)
    vmem_limit = int(min(max(2 * vmem_est, 32 << 20), 48 << 20))

    out = pl.pallas_call(
        _lora_linear_kernel,
        out_shape=jax.ShapeDtypeStruct((M_pad, N_pad), hidden_states.dtype),
        grid_spec=pltpu.PrefetchScalarGridSpec(
            num_scalar_prefetch=0,
            grid=grid,
            in_specs=[
                pl.BlockSpec((tm, tk), lambda i, j, k: (i, k)),       # x tile
                pl.BlockSpec((tk, tn), lambda i, j, k: (k, j)),       # W^T slab
                pl.BlockSpec((tm, r_pad), lambda i, j, k: (i, 0)),    # t = x @ A^T (resident per i)
                pl.BlockSpec((r_pad, tn), lambda i, j, k: (0, j)),    # B^T (scaled, resident per j)
            ],
            out_specs=pl.BlockSpec((tm, tn), lambda i, j, k: (i, j)),
            scratch_shapes=[
                pltpu.VMEM((tm, tn), jnp.float32),     # base+lora fp32 accumulator
            ],
        ),
        compiler_params=pltpu.CompilerParams(
            dimension_semantics=("parallel", "parallel", "arbitrary"),
            vmem_limit_bytes=vmem_limit),
        cost_estimate=cost,
    )(xm, w_t, t, b_t)

    return out[:M, :out_features].reshape(B, S, out_features)


if __name__ == "__main__":
    key = jax.random.PRNGKey(0)
    keys = jax.random.split(key, 8)

    # ---------------- Test 1: tiny shapes, auto-chosen tiles ----------------
    B, S = 2, 8
    in_features, out_features, r, alpha = 32, 64, 8, 16
    scaling = alpha / r  # use_rslora_ = False

    hidden_states = jax.random.normal(keys[0], (B, S, in_features), dtype=jnp.float32)
    base_weight = jax.random.normal(keys[1], (out_features, in_features), dtype=jnp.float32) * 0.05
    # reset_parameters(): lora_b would be zeros; use nonzero lora_b so the LoRA
    # path is exercised (synthetic weights, not a checkpoint).
    lora_a = jax.random.normal(keys[2], (r, in_features), dtype=jnp.float32) * 0.1
    lora_b = jax.random.normal(keys[3], (out_features, r), dtype=jnp.float32) * 0.1

    tm, tn, tk = choose_tiles(B * S, in_features, out_features)
    w_t, a_t, b_t = prepare_lora_weights(base_weight, lora_a, lora_b, scaling,
                                         tn=tn, tk=tk, compute_dtype=jnp.float32)
    out = lora_linear_forward(hidden_states, w_t, a_t, b_t,
                              out_features=out_features, tm=tm, tn=tn, tk=tk)
    out = jax.block_until_ready(out)

    xm = hidden_states.reshape(-1, in_features).astype(jnp.float32)
    ref = xm @ base_weight.T + scaling * ((xm @ lora_a.T) @ lora_b.T)
    ref = ref.reshape(B, S, out_features)
    assert out.shape == (B, S, out_features)
    assert jnp.allclose(out, ref, atol=1e-4, rtol=1e-4), float(jnp.max(jnp.abs(out - ref)))

    # bf16 smoke test: bf16 activations/base weight; LoRA A/B pre-cast to bf16 so
    # the down/up projections run with native MXU operands + fp32 accumulation.
    hs_bf = hidden_states.astype(jnp.bfloat16)
    w_bf = base_weight.astype(jnp.bfloat16)
    w_t16, a_t16, b_t16 = prepare_lora_weights(w_bf, lora_a, lora_b, scaling,
                                               tn=tn, tk=tk, compute_dtype=jnp.bfloat16)
    out_bf = lora_linear_forward(hs_bf, w_t16, a_t16, b_t16,
                                 out_features=out_features, tm=tm, tn=tn, tk=tk)
    out_bf = jax.block_until_ready(out_bf)
    assert out_bf.shape == (B, S, out_features)
    assert jnp.allclose(out_bf.astype(jnp.float32), ref, atol=5e-2, rtol=5e-2)

    # ------- Test 2: exercise the full M/N/K grid with explicit small tiles -------
    B2, S2, K2, N2, r2 = 2, 64, 256, 384, 16
    scaling2 = 2.0
    hs2 = jax.random.normal(keys[4], (B2, S2, K2), dtype=jnp.float32)
    w2 = jax.random.normal(keys[5], (N2, K2), dtype=jnp.float32) * 0.02
    a2 = jax.random.normal(keys[6], (r2, K2), dtype=jnp.float32) * 0.05
    b2 = jax.random.normal(keys[7], (N2, r2), dtype=jnp.float32) * 0.05
    tm2, tn2, tk2 = 64, 128, 128                       # grid = (2, 3, 2)
    w_t2, a_t2, b_t2 = prepare_lora_weights(w2, a2, b2, scaling2,
                                            tn=tn2, tk=tk2, compute_dtype=jnp.float32)
    out2 = lora_linear_forward(hs2, w_t2, a_t2, b_t2,
                               out_features=N2, tm=tm2, tn=tn2, tk=tk2)
    out2 = jax.block_until_ready(out2)
    xm2 = hs2.reshape(-1, K2)
    ref2 = (xm2 @ w2.T + scaling2 * ((xm2 @ a2.T) @ b2.T)).reshape(B2, S2, N2)
    assert out2.shape == (B2, S2, N2)
    assert jnp.allclose(out2, ref2, atol=1e-2, rtol=1e-2), float(jnp.max(jnp.abs(out2 - ref2)))

    print("KERNEL_OK")
</pallas_src>

<mosaic_0001>
module attributes {stable_mosaic.version = 11 : i64} {
  func.func @_lora_linear_kernel(%arg0: i32, %arg1: i32, %arg2: i32, %arg3: memref<16x128xf32, #tpu.memory_space<vmem>>, %arg4: memref<128x128xf32, #tpu.memory_space<vmem>>, %arg5: memref<16x128xf32, #tpu.memory_space<vmem>>, %arg6: memref<128x128xf32, #tpu.memory_space<vmem>>, %arg7: memref<16x128xf32, #tpu.memory_space<vmem>>, %arg8: memref<16x128xf32, #tpu.memory_space<vmem>>) attributes {dimension_semantics = [#tpu.dimension_semantics<parallel>, #tpu.dimension_semantics<parallel>, #tpu.dimension_semantics<arbitrary>], iteration_bounds = array<i64: 1, 1, 1>, scalar_prefetch = 0 : i64, scratch_operands = 1 : i64, tpu.core_type = #tpu.core_type<tc>, window_params = [{transform_indices = @transform_0, window_bounds = array<i64: 16, 128>}, {transform_indices = @transform_1, window_bounds = array<i64: 128, 128>}, {transform_indices = @transform_2, window_bounds = array<i64: 16, 128>}, {transform_indices = @transform_3, window_bounds = array<i64: 128, 128>}, {transform_indices = @transform_4, window_bounds = array<i64: 16, 128>}]} {
    %c0_i32 = arith.constant 0 : i32
    %0 = arith.cmpi eq, %arg2, %c0_i32 : i32
    %1 = arith.extui %0 : i1 to i32
    %c0_i32_0 = arith.constant 0 : i32
    %2 = arith.cmpi ne, %1, %c0_i32_0 : i32
    scf.if %2 {
      %cst_10 = arith.constant 0.000000e+00 : f32
      %12 = vector.broadcast %cst_10 : f32 to vector<16x128xf32>
      %c0_11 = arith.constant 0 : index
      %c0_12 = arith.constant 0 : index
      %13 = vector.load %arg8[%c0_11, %c0_12] : memref<16x128xf32, #tpu.memory_space<vmem>>, vector<16x128xf32>
      tpu.vector_store %arg8[%c0_11, %c0_12], %12 {strides = array<i32>} : memref<16x128xf32, #tpu.memory_space<vmem>>, vector<16x128xf32>,
    } else {
    }
    %c0 = arith.constant 0 : index
    %c0_1 = arith.constant 0 : index
    %3 = vector.load %arg8[%c0, %c0_1] : memref<16x128xf32, #tpu.memory_space<vmem>>, vector<16x128xf32>
    %c0_2 = arith.constant 0 : index
    %c0_3 = arith.constant 0 : index
    %4 = vector.load %arg3[%c0_2, %c0_3] : memref<16x128xf32, #tpu.memory_space<vmem>>, vector<16x128xf32>
    %c0_4 = arith.constant 0 : index
    %c0_5 = arith.constant 0 : index
    %5 = vector.load %arg4[%c0_4, %c0_5] : memref<128x128xf32, #tpu.memory_space<vmem>>, vector<128x128xf32>
    %cst = arith.constant dense<0.000000e+00> : vector<16x128xf32>
    %6 = tpu.matmul %4, %5, %cst {dimension_numbers = #tpu.dot_dimension_numbers<[1], [0], [0], [1], [0, 0, 1, 1], [], []>} : vector<16x128xf32>, vector<128x128xf32>, vector<16x128xf32> -> vector<16x128xf32>
    %7 = arith.addf %3, %6 : vector<16x128xf32>
    %c0_6 = arith.constant 0 : index
    %c0_7 = arith.constant 0 : index
    %8 = vector.load %arg8[%c0_6, %c0_7] : memref<16x128xf32, #tpu.memory_space<vmem>>, vector<16x128xf32>
    tpu.vector_store %arg8[%c0_6, %c0_7], %7 {strides = array<i32>} : memref<16x128xf32, #tpu.memory_space<vmem>>, vector<16x128xf32>,
    %c0_i32_8 = arith.constant 0 : i32
    %9 = arith.cmpi eq, %arg2, %c0_i32_8 : i32
    %10 = arith.extui %9 : i1 to i32
    %c0_i32_9 = arith.constant 0 : i32
    %11 = arith.cmpi ne, %10, %c0_i32_9 : i32
    scf.if %11 {
      %c0_10 = arith.constant 0 : index
      %c0_11 = arith.constant 0 : index
      %12 = vector.load %arg5[%c0_10, %c0_11] : memref<16x128xf32, #tpu.memory_space<vmem>>, vector<16x128xf32>
      %c0_12 = arith.constant 0 : index
      %c0_13 = arith.constant 0 : index
      %13 = vector.load %arg6[%c0_12, %c0_13] : memref<128x128xf32, #tpu.memory_space<vmem>>, vector<128x128xf32>
      %cst_14 = arith.constant dense<0.000000e+00> : vector<16x128xf32>
      %14 = tpu.matmul %12, %13, %cst_14 {dimension_numbers = #tpu.dot_dimension_numbers<[1], [0], [0], [1], [0, 0, 1, 1], [], []>} : vector<16x128xf32>, vector<128x128xf32>, vector<16x128xf32> -> vector<16x128xf32>
      %c0_15 = arith.constant 0 : index
      %c0_16 = arith.constant 0 : index
      %15 = vector.load %arg8[%c0_15, %c0_16] : memref<16x128xf32, #tpu.memory_space<vmem>>, vector<16x128xf32>
      %16 = arith.addf %15, %14 : vector<16x128xf32>
      %c0_17 = arith.constant 0 : index
      %c0_18 = arith.constant 0 : index
      %17 = vector.load %arg7[%c0_17, %c0_18] : memref<16x128xf32, #tpu.memory_space<vmem>>, vector<16x128xf32>
      tpu.vector_store %arg7[%c0_17, %c0_18], %16 {strides = array<i32>} : memref<16x128xf32, #tpu.memory_space<vmem>>, vector<16x128xf32>,
    } else {
    }
    return
  }
  func.func @transform_0(%arg0: i32, %arg1: i32, %arg2: i32) -> (i32, i32) {
    %c0_i32 = arith.constant 0 : i32
    return %arg0, %arg2 : i32, i32
  }
  func.func @transform_1(%arg0: i32, %arg1: i32, %arg2: i32) -> (i32, i32) {
    %c0_i32 = arith.constant 0 : i32
    return %arg2, %arg1 : i32, i32
  }
  func.func @transform_2(%arg0: i32, %arg1: i32, %arg2: i32) -> (i32, i32) {
    %c0_i32 = arith.constant 0 : i32
    %c0_i32_0 = arith.constant 0 : i32
    return %arg0, %c0_i32 : i32, i32
  }
  func.func @transform_3(%arg0: i32, %arg1: i32, %arg2: i32) -> (i32, i32) {
    %c0_i32 = arith.constant 0 : i32
    %c0_i32_0 = arith.constant 0 : i32
    return %c0_i32, %arg1 : i32, i32
  }
  func.func @transform_4(%arg0: i32, %arg1: i32, %arg2: i32) -> (i32, i32) {
    %c0_i32 = arith.constant 0 : i32
    return %arg0, %arg1 : i32, i32
  }
}

</mosaic_0001>

<bundles_post_ra>
// kernel: lora_linear_forward.1
= control target key start
LH: loop header
LB: loop body
LE: loop exit
PB: predicated region body
PF: predicated region fallthrough
CT: control target
= control target key end

     0   :  { %9 = vsyncpa [#allocation4], 0  ;;  %s374_s15 = smov [#allocation3]   ;;  %s471_s0 = inlined_call_operand.vmem [shape: f32[16,128], index: 0, kind: input, shape index: {}]   ;;  %s472_s1 = inlined_call_operand.vmem [shape: f32[128,128], index: 1, kind: input, shape index: {}]   ;;  %s473_s2 = inlined_call_operand.vmem [shape: f32[16,128], index: 2, kind: input, shape index: {}]   ;;  %s474_s3 = inlined_call_operand.hbm [shape: f32[128,128], index: 3, kind: input, shape index: {}]   ;;  %s475_s4 = inlined_call_operand.vmem [shape: f32[16,128], index: 4, kind: output, shape index: {}]  }
   0x1   :  { %s21_s16 = sshll.u32 %s374_s15, 4  ;;  %s22_s16 = int_to_ptr.vmem [resolvable:$true] %s21_s16 }
   0x2   :  { %s360_s17 = scalar_lea.vmem %s22_s16, 2048  ;;  %p365_p1 = scmp.lt.s32.totalorder %s22_s16, %s22_s16 }
   0x3   :  { %p361_p0 = scmp.ne.s32.totalorder %s22_s16, %s360_s17  ;;  %p366_p2 = scmp.lt.s32.totalorder %s360_s17, %s360_s17 }
   0x5   :  { %p367_p3 = por %p366_p2, %p365_p1 }
   0x7   :  { %p368_p4 = pnand %p367_p3, %p361_p0 }
   0x9   :  { %371 = shalt.err (!%p368_p4)
}
   0xa   :  { %s375_s18 = smov 128   ;;  %s376_s19 = smov 8  }
   0xb   :  { %27 = dma.hbm_to_vmem [thread:$0]  %s474_s3, 2048, %s22_s16, [#allocation4], %s375_s18, %s375_s18, %s376_s19  }
   0xc   :  { %372 = dma.done.wait [#allocation4], 2048  }
   0xd   :  { %373 = vsyncadd [#allocation4], 4294965248  ;;  %v56_v0 = vld [vmem:[%s472_s1 + $0x78] sm:$0xff]  ;;  %v55_v2 = vld [vmem:[%s472_s1 + $0x70] sm:$0xff] }
   0xe   :  { %v156_v1 = vld [vmem:[#allocation3 + $0x78] sm:$0xff]  ;;  %279 = vmatprep.subr.mxu0 %v56_v0  ;;  %v155_v3 = vld [vmem:[#allocation3 + $0x70] sm:$0xff]  ;;  %v54_v4 = vld [vmem:[%s472_s1 + $0x68] sm:$0xff] }
   0xf   :  { %314 = vmatprep.subr.mxu1 %v156_v1  ;;  %280 = vmatpush3.msra.mxu0 %v56_v0  ;;  %v154_v5 = vld [vmem:[#allocation3 + $0x68] sm:$0xff]  ;;  %v53_v6 = vld [vmem:[%s472_s1 + $0x60] sm:$0xff]  ;;  %v52_v8 = vld [vmem:[%s472_s1 + $0x58] sm:$0xff] }
  0x10   :  { %315 = vmatpush3.msra.mxu1 %v156_v1  ;;  %281 = vmatprep.subr.mxu0 %v55_v2  ;;  %v153_v7 = vld [vmem:[#allocation3 + $0x60] sm:$0xff]  ;;  %v152_v9 = vld [vmem:[#allocation3 + $0x58] sm:$0xff]  ;;  %v51_v10 = vld [vmem:[%s472_s1 + $0x50] sm:$0xff] }
  0x11   :  { %316 = vmatprep.subr.mxu1 %v155_v3  ;;  %282 = vmatpush3.msra.mxu0 %v55_v2  ;;  %v151_v11 = vld [vmem:[#allocation3 + $0x50] sm:$0xff]  ;;  %v50_v12 = vld [vmem:[%s472_s1 + $0x48] sm:$0xff]  ;;  %v49_v14 = vld [vmem:[%s472_s1 + $0x40] sm:$0xff] }
  0x12   :  { %317 = vmatpush3.msra.mxu1 %v155_v3  ;;  %283 = vmatprep.subr.mxu0 %v54_v4  ;;  %v150_v13 = vld [vmem:[#allocation3 + $0x48] sm:$0xff]  ;;  %v149_v15 = vld [vmem:[#allocation3 + $0x40] sm:$0xff]  ;;  %v48_v16 = vld [vmem:[%s472_s1 + $0x38] sm:$0xff] }
  0x13   :  { %318 = vmatprep.subr.mxu1 %v154_v5  ;;  %284 = vmatpush3.msra.mxu0 %v54_v4  ;;  %v148_v17 = vld [vmem:[#allocation3 + $0x38] sm:$0xff]  ;;  %v47_v18 = vld [vmem:[%s472_s1 + $0x30] sm:$0xff]  ;;  %v46_v20 = vld [vmem:[%s472_s1 + $0x28] sm:$0xff] }
  0x14   :  { %319 = vmatpush3.msra.mxu1 %v154_v5  ;;  %285 = vmatprep.subr.mxu0 %v53_v6  ;;  %v147_v19 = vld [vmem:[#allocation3 + $0x30] sm:$0xff]  ;;  %v146_v21 = vld [vmem:[#allocation3 + $0x28] sm:$0xff]  ;;  %v45_v22 = vld [vmem:[%s472_s1 + $0x20] sm:$0xff] }
  0x15   :  { %320 = vmatprep.subr.mxu1 %v153_v7  ;;  %286 = vmatpush3.msra.mxu0 %v53_v6  ;;  %v145_v23 = vld [vmem:[#allocation3 + $0x20] sm:$0xff]  ;;  %v44_v24 = vld [vmem:[%s472_s1 + $0x18] sm:$0xff]  ;;  %v43_v26 = vld [vmem:[%s472_s1 + $0x10] sm:$0xff] }
  0x16   :  { %321 = vmatpush3.msra.mxu1 %v153_v7  ;;  %287 = vmatprep.subr.mxu0 %v52_v8  ;;  %v144_v25 = vld [vmem:[#allocation3 + $0x18] sm:$0xff]  ;;  %v143_v27 = vld [vmem:[#allocation3 + $0x10] sm:$0xff]  ;;  %v42_v28 = vld [vmem:[%s472_s1 + $0x8] sm:$0xff] }
  0x17   :  { %322 = vmatprep.subr.mxu1 %v152_v9  ;;  %288 = vmatpush3.msra.mxu0 %v52_v8  ;;  %v142_v29 = vld [vmem:[#allocation3 + $0x8] sm:$0xff]  ;;  %v41_v30 = vld [vmem:[%s472_s1] sm:$0xff] }
  0x18   :  { %323 = vmatpush3.msra.mxu1 %v152_v9  ;;  %289 = vmatprep.subr.mxu0 %v51_v10  ;;  %v141_v31 = vld [vmem:[#allocation3] sm:$0xff]  ;;  %v40_v34 = vld [vmem:[%s471_s0 + $0x8] sm:$0xff] }
  0x19   :  { %324 = vmatprep.subr.mxu1 %v151_v11  ;;  %290 = vmatpush3.msra.mxu0 %v51_v10  ;;  %v39_v32 = vld [vmem:[%s471_s0] sm:$0xff]  ;;  %v140_v35 = vld [vmem:[%s473_s2 + $0x8] sm:$0xff] }
  0x1a   :  { %325 = vmatpush3.msra.mxu1 %v151_v11  ;;  %291 = vmatprep.subr.mxu0 %v50_v12  ;;  %v139_v33 = vld [vmem:[%s473_s2] sm:$0xff] }
  0x1b   :  { %326 = vmatprep.subr.mxu1 %v150_v13  ;;  %292 = vmatpush3.msra.mxu0 %v50_v12 }
  0x1c   :  { %327 = vmatpush3.msra.mxu1 %v150_v13  ;;  %293 = vmatprep.subr.mxu0 %v49_v14 }
  0x1d   :  { %328 = vmatprep.subr.mxu1 %v149_v15  ;;  %294 = vmatpush3.msra.mxu0 %v49_v14 }
  0x1e   :  { %329 = vmatpush3.msra.mxu1 %v149_v15  ;;  %295 = vmatprep.subr.mxu0 %v48_v16 }
  0x1f   :  { %330 = vmatprep.subr.mxu1 %v148_v17  ;;  %296 = vmatpush3.msra.mxu0 %v48_v16 }
  0x20   :  { %331 = vmatpush3.msra.mxu1 %v148_v17  ;;  %297 = vmatprep.subr.mxu0 %v47_v18 }
  0x21   :  { %332 = vmatprep.subr.mxu1 %v147_v19  ;;  %298 = vmatpush3.msra.mxu0 %v47_v18 }
  0x22   :  { %333 = vmatpush3.msra.mxu1 %v147_v19  ;;  %299 = vmatprep.subr.mxu0 %v46_v20 }
  0x23   :  { %334 = vmatprep.subr.mxu1 %v146_v21  ;;  %300 = vmatpush3.msra.mxu0 %v46_v20 }
  0x24   :  { %335 = vmatpush3.msra.mxu1 %v146_v21  ;;  %301 = vmatprep.subr.mxu0 %v45_v22 }
  0x25   :  { %336 = vmatprep.subr.mxu1 %v145_v23  ;;  %302 = vmatpush3.msra.mxu0 %v45_v22 }
  0x26   :  { %337 = vmatpush3.msra.mxu1 %v145_v23  ;;  %303 = vmatprep.subr.mxu0 %v44_v24 }
  0x27   :  { %338 = vmatprep.subr.mxu1 %v144_v25  ;;  %304 = vmatpush3.msra.mxu0 %v44_v24 }
  0x28   :  { %339 = vmatpush3.msra.mxu1 %v144_v25  ;;  %305 = vmatprep.subr.mxu0 %v43_v26 }
  0x29   :  { %340 = vmatprep.subr.mxu1 %v143_v27  ;;  %306 = vmatpush3.msra.mxu0 %v43_v26 }
  0x2a   :  { %341 = vmatpush3.msra.mxu1 %v143_v27  ;;  %307 = vmatprep.subr.mxu0 %v42_v28 }
  0x2b   :  { %342 = vmatprep.subr.mxu1 %v142_v29  ;;  %308 = vmatpush3.msra.mxu0 %v42_v28 }
  0x2c   :  { %343 = vmatpush3.msra.mxu1 %v142_v29  ;;  %309 = vmatprep.subr.mxu0 %v41_v30 }
  0x2d   :  { %344 = vmatprep.subr.mxu1 %v141_v31  ;;  %310 = vmatpush3.msra.mxu0 %v41_v30 }
  0x2e   :  { %311 = vmatprep.mubr.f32.mxu0 %v39_v32  ;;  %345 = vmatpush3.msra.mxu1 %v141_v31 }
  0x2f   :  { %346 = vmatprep.mubr.f32.mxu1 %v139_v33  ;;  %312 = vmatmul.mubr.f32.vlgmr.msra.gmra.mxu0 %v40_v34 }
  0x30   :  { %347 = vmatmul.mubr.f32.vlgmr.msra.gmra.mxu1 %v140_v35 }
  0xef   :  { %v313_v36 = vpop.f32.mrf.mxu0 }
  0xf0   :  { %v348_v37 = vpop.f32.mrf.mxu1 }
  0xf1   :  { %v235_v38 = vadd.f32 %v348_v37, %v313_v36  ;;  %v123_v39 = vpop.f32.mrf.mxu0 }
  0xf2   :  { %v223_v40 = vpop.f32.mrf.mxu1 }
  0xf3   :  { %237 = vst [vmem:[%s475_s4 + $0x8] sm:$0xff] %v235_v38  ;;  %v234_v41 = vadd.f32 %v223_v40, %v123_v39 }
  0xf5   :  { %236 = vst [vmem:[%s475_s4] sm:$0xff] %v234_v41 }
  0xf6   :  { %242 = vsyncpa [#allocation4], 1 }

</bundles_post_ra>
